<compile_context>
chip_gen: v5e
topology: v5e:2x2
jax: 0.10.0
libtpu: 0.0.40
codegen_flags: <defaults>
</compile_context>

<pallas_src>
import functools

import jax
import jax.numpy as jnp
from jax import lax
from jax.experimental import pallas as pl
from jax.experimental.pallas import tpu as pltpu


_TARGET_BLOCK_BYTES = 2 * 1024 * 1024    # ~2 MiB Kernel-A input blocks (good on v5e/v6e/v7x)
_VMEM_LIMIT_BYTES = 32 * 1024 * 1024     # <= physical VMEM on every generation (v7x: 64 MiB)
_SMALL_SAMPLE_BYTES = 2 * 1024 * 1024    # per-sample cutoff for the in-VMEM gather path
_DMA_SLOTS = 8                           # channel copies kept in flight on the DMA path


# --------------------------------------------------------------------------
# Kernel A: streaming global average pool -> per-sample channel means (B, C, 1)
# --------------------------------------------------------------------------
def _gap_kernel(x_ref, o_ref, acc_ref, *, hw_total, tile_hw, need_mask):
    t = pl.program_id(1)
    last = pl.num_programs(1) - 1

    @pl.when(t == 0)
    def _init():
        acc_ref[...] = jnp.zeros_like(acc_ref)

    xv = x_ref[0].astype(jnp.float32)                 # (C, tile_hw)

    if need_mask:
        # Mask only the final (ragged) HW tile; all other tiles take the
        # unmasked fast path (saves 3 VPU ops/element on every full tile).
        @pl.when(t < last)
        def _full():
            acc_ref[...] += jnp.sum(xv, axis=-1, keepdims=True)

        @pl.when(t == last)
        def _tail():
            col = lax.broadcasted_iota(jnp.int32, xv.shape, 1) + t * tile_hw
            acc_ref[...] += jnp.sum(jnp.where(col < hw_total, xv, 0.0),
                                    axis=-1, keepdims=True)
    else:
        acc_ref[...] += jnp.sum(xv, axis=-1, keepdims=True)

    @pl.when(t == last)
    def _finalize():
        o_ref[0] = (acc_ref[...] * jnp.float32(1.0 / hw_total)).astype(o_ref.dtype)


# --------------------------------------------------------------------------
# Kernel B (small/medium maps): whole-sample in-VMEM channel permutation
# --------------------------------------------------------------------------
def _permute_vmem_kernel(idx_ref, x_ref, o_ref, *, channels, unroll):
    b = pl.program_id(0)

    def body(i, carry):
        j = idx_ref[b, i]                              # scalar-prefetched rank -> channel
        o_ref[0, pl.ds(i, 1), :] = x_ref[0, pl.ds(j, 1), :]
        return carry

    lax.fori_loop(0, channels, body, 0, unroll=unroll)


# --------------------------------------------------------------------------
# Kernel B (large maps): per-channel HBM->HBM DMA gather, n_slots in flight
# --------------------------------------------------------------------------
def _permute_dma_kernel(idx_ref, x_ref, o_ref, sems, *, channels, n_slots):
    b = pl.program_id(0)

    def _start(i):
        j = idx_ref[b, i]
        pltpu.make_async_copy(x_ref.at[b, j], o_ref.at[b, i],
                              sems.at[i % n_slots]).start()

    def _wait(i):
        # Source ref here only fixes the transfer size; the matching DMA for
        # output channel i was issued by _start(i) on the same semaphore slot.
        pltpu.make_async_copy(x_ref.at[b, 0], o_ref.at[b, i],
                              sems.at[i % n_slots]).wait()

    def issue(i, carry):
        @pl.when(i >= n_slots)
        def _():
            _wait(i - n_slots)
        _start(i)
        return carry

    lax.fori_loop(0, channels, issue, 0)

    def drain(i, carry):
        _wait(i)
        return carry

    lax.fori_loop(max(channels - n_slots, 0), channels, drain, 0)


# --------------------------------------------------------------------------
# Wrapper
# --------------------------------------------------------------------------
def _choose_hw_tile(hw, c, itemsize):
    """Lane-dense tile along the flattened H*W axis (~2 MiB per input block)."""
    if hw <= 128:
        return hw                                      # single full-extent tile
    per_channel = max(128, _TARGET_BLOCK_BYTES // (itemsize * max(c, 1)))
    tile = min(hw, per_channel)
    return max(128, (tile // 128) * 128)


def eca_forward(x, conv_weight, *, gather_impl=None):
    """ECA forward. x: (B, C, H, W); conv_weight: (k,) 1-D conv taps (no bias).

    gather_impl: None (auto by size), "vmem", or "dma" — Kernel-B variant.
    """
    B, C, H, W = x.shape
    HW = H * W
    k = int(conv_weight.shape[0])
    pad = (k - 1) // 2

    x3 = x.reshape(B, C, HW)

    # ---- Kernel A: per-sample per-channel means (streaming reduction) ----
    tile_hw = _choose_hw_tile(HW, C, x.dtype.itemsize)
    n_hw_tiles = (HW + tile_hw - 1) // tile_hw

    pooled = pl.pallas_call(
        functools.partial(_gap_kernel, hw_total=HW, tile_hw=tile_hw,
                          need_mask=(HW % tile_hw != 0)),
        out_shape=jax.ShapeDtypeStruct((B, C, 1), jnp.float32),
        grid_spec=pltpu.PrefetchScalarGridSpec(
            num_scalar_prefetch=0,
            grid=(B, n_hw_tiles),
            in_specs=[pl.BlockSpec((1, C, tile_hw), lambda b, t: (b, 0, t))],
            out_specs=pl.BlockSpec((1, C, 1), lambda b, t: (b, 0, 0)),
            scratch_shapes=[pltpu.VMEM((C, 1), jnp.float32)],
        ),
        compiler_params=pltpu.CompilerParams(
            dimension_semantics=("parallel", "arbitrary"),
            vmem_limit_bytes=_VMEM_LIMIT_BYTES),
    )(x3)[:, :, 0]                                      # (B, C) f32 channel means

    # ---- k-tap channel conv + sigmoid + ranking on the tiny (B, C) tensor ----
    w = conv_weight.astype(jnp.float32)
    yp = jnp.pad(pooled, ((0, 0), (pad, pad)))
    z = sum(w[t] * yp[:, t:t + C] for t in range(k))
    # sigmoid is monotonic (cannot change the top_k order) — kept only because
    # it is free at (B, C) size and gives exact parity with the torch module.
    s = jax.nn.sigmoid(z)
    # TODO(synk): lax.top_k may break ties differently than torch.topk when scores are equal.
    _, idx = lax.top_k(s, C)                            # (B, C) descending ranks
    idx = idx.astype(jnp.int32)

    # ---- Kernel B: per-sample channel permutation gather ----
    per_sample_bytes = C * HW * x.dtype.itemsize
    impl = gather_impl or ("vmem" if per_sample_bytes <= _SMALL_SAMPLE_BYTES else "dma")

    if impl == "vmem":
        out3 = pl.pallas_call(
            functools.partial(_permute_vmem_kernel, channels=C, unroll=C <= 64),
            out_shape=jax.ShapeDtypeStruct((B, C, HW), x.dtype),
            grid_spec=pltpu.PrefetchScalarGridSpec(
                num_scalar_prefetch=1,
                grid=(B,),
                in_specs=[pl.BlockSpec((1, C, HW), lambda b, idx_ref: (b, 0, 0))],
                out_specs=pl.BlockSpec((1, C, HW), lambda b, idx_ref: (b, 0, 0)),
            ),
            compiler_params=pltpu.CompilerParams(
                dimension_semantics=("parallel",),
                vmem_limit_bytes=_VMEM_LIMIT_BYTES),
        )(idx, x3)
    else:
        n_slots = min(_DMA_SLOTS, C)
        out3 = pl.pallas_call(
            functools.partial(_permute_dma_kernel, channels=C, n_slots=n_slots),
            out_shape=jax.ShapeDtypeStruct((B, C, HW), x.dtype),
            grid_spec=pltpu.PrefetchScalarGridSpec(
                num_scalar_prefetch=1,
                grid=(B,),
                in_specs=[pl.BlockSpec(memory_space=pl.ANY)],
                out_specs=pl.BlockSpec(memory_space=pl.ANY),
                scratch_shapes=[pltpu.SemaphoreType.DMA((n_slots,))],
            ),
            compiler_params=pltpu.CompilerParams(
                dimension_semantics=("parallel",)),
        )(idx, x3)

    return out3.reshape(B, C, H, W)


class EcaLayer:
    """JAX/Pallas mirror of the PyTorch Eca_layer (Conv1d(1, 1, k, bias=False))."""

    def __init__(self, k_size=3, *, key=None):
        if key is None:
            key = jax.random.PRNGKey(0)
        bound = 1.0 / float(k_size) ** 0.5              # kaiming-uniform bound, fan_in = k
        self.weight = jax.random.uniform(key, (k_size,), jnp.float32,
                                         minval=-bound, maxval=bound)

    def __call__(self, x):
        return eca_forward(x, self.weight)


# --------------------------------------------------------------------------
# Pure-JAX reference for validation
# --------------------------------------------------------------------------
def _eca_reference(x, conv_weight):
    B, C, H, W = x.shape
    k = conv_weight.shape[0]
    pad = (k - 1) // 2
    y = jnp.mean(x.astype(jnp.float32), axis=(2, 3))             # (B, C)
    yp = jnp.pad(y, ((0, 0), (pad, pad)))
    z = sum(conv_weight[t] * yp[:, t:t + C] for t in range(k))
    s = jax.nn.sigmoid(z)
    _, idx = lax.top_k(s, C)
    return jnp.take_along_axis(x, idx[:, :, None, None], axis=1)


if __name__ == "__main__":
    key = jax.random.PRNGKey(0)
    kx, kw, kx2, kx3 = jax.random.split(key, 4)

    layer = EcaLayer(k_size=3, key=kw)

    # (1) Small lane-dense spatial map (H*W multiple of 128) -> in-VMEM gather path.
    x = jax.random.normal(kx, (2, 4, 16, 16), dtype=jnp.float32)
    y = jax.block_until_ready(layer(x))
    assert y.shape == x.shape and y.dtype == x.dtype
    assert bool(jnp.allclose(y, _eca_reference(x, layer.weight), rtol=1e-5, atol=1e-5)), \
        "mismatch vs reference (16x16, vmem gather)"

    # (2) Spatial map not a multiple of 128 (single full-extent HW tile).
    x2 = jax.random.normal(kx2, (2, 6, 7, 7), dtype=jnp.float32)
    y2 = jax.block_until_ready(layer(x2))
    assert bool(jnp.allclose(y2, _eca_reference(x2, layer.weight), rtol=1e-5, atol=1e-5)), \
        "mismatch vs reference (7x7, vmem gather)"

    # (3) Force the HBM->HBM DMA gather path (auto-selected for large feature maps).
    x3 = jax.random.normal(kx3, (2, 8, 32, 32), dtype=jnp.float32)
    y3 = jax.block_until_ready(eca_forward(x3, layer.weight, gather_impl="dma"))
    assert bool(jnp.allclose(y3, _eca_reference(x3, layer.weight), rtol=1e-5, atol=1e-5)), \
        "mismatch vs reference (32x32, dma gather)"

    print("KERNEL_OK")
</pallas_src>

<mosaic_0001>
module attributes {stable_mosaic.version = 11 : i64} {
  func.func @_gap_kernel(%arg0: i32, %arg1: i32, %arg2: memref<1x4x256xf32, #tpu.memory_space<vmem>>, %arg3: memref<1x4x1xf32, #tpu.memory_space<vmem>>, %arg4: memref<4x1xf32, #tpu.memory_space<vmem>>) attributes {dimension_semantics = [#tpu.dimension_semantics<parallel>, #tpu.dimension_semantics<arbitrary>], iteration_bounds = array<i64: 2, 1>, scalar_prefetch = 0 : i64, scratch_operands = 1 : i64, tpu.core_type = #tpu.core_type<tc>, window_params = [{transform_indices = @transform_0, window_bounds = array<i64: 1, 4, 256>}, {transform_indices = @transform_1, window_bounds = array<i64: 1, 4, 1>}]} {
    %c0_i32 = arith.constant 0 : i32
    %0 = arith.cmpi eq, %arg1, %c0_i32 : i32
    %1 = arith.extui %0 : i1 to i32
    %c0_i32_0 = arith.constant 0 : i32
    %2 = arith.cmpi ne, %1, %c0_i32_0 : i32
    scf.if %2 {
      %cst_9 = arith.constant 0.000000e+00 : f32
      %13 = vector.broadcast %cst_9 : f32 to vector<4x1xf32>
      %c0_10 = arith.constant 0 : index
      %c0_11 = arith.constant 0 : index
      %14 = vector.load %arg4[%c0_10, %c0_11] : memref<4x1xf32, #tpu.memory_space<vmem>>, vector<4x1xf32>
      tpu.vector_store %arg4[%c0_10, %c0_11], %13 {strides = array<i32>} : memref<4x1xf32, #tpu.memory_space<vmem>>, vector<4x1xf32>,
    } else {
    }
    %c0 = arith.constant 0 : index
    %c0_1 = arith.constant 0 : index
    %c0_2 = arith.constant 0 : index
    %3 = vector.load %arg2[%c0, %c0_1, %c0_2] : memref<1x4x256xf32, #tpu.memory_space<vmem>>, vector<1x4x256xf32>
    %4 = vector.shape_cast %3 : vector<1x4x256xf32> to vector<4x256xf32>
    %c0_3 = arith.constant 0 : index
    %c0_4 = arith.constant 0 : index
    %5 = vector.load %arg4[%c0_3, %c0_4] : memref<4x1xf32, #tpu.memory_space<vmem>>, vector<4x1xf32>
    %cst = arith.constant dense<0.000000e+00> : vector<4xf32>
    %6 = vector.multi_reduction <add>, %4, %cst [1] : vector<4x256xf32> to vector<4xf32>
    %7 = vector.shape_cast %6 : vector<4xf32> to vector<4x1xf32>
    %8 = arith.addf %5, %7 : vector<4x1xf32>
    %c0_5 = arith.constant 0 : index
    %c0_6 = arith.constant 0 : index
    %9 = vector.load %arg4[%c0_5, %c0_6] : memref<4x1xf32, #tpu.memory_space<vmem>>, vector<4x1xf32>
    tpu.vector_store %arg4[%c0_5, %c0_6], %8 {strides = array<i32>} : memref<4x1xf32, #tpu.memory_space<vmem>>, vector<4x1xf32>,
    %c0_i32_7 = arith.constant 0 : i32
    %10 = arith.cmpi eq, %arg1, %c0_i32_7 : i32
    %11 = arith.extui %10 : i1 to i32
    %c0_i32_8 = arith.constant 0 : i32
    %12 = arith.cmpi ne, %11, %c0_i32_8 : i32
    scf.if %12 {
      %c0_9 = arith.constant 0 : index
      %c0_10 = arith.constant 0 : index
      %13 = vector.load %arg4[%c0_9, %c0_10] : memref<4x1xf32, #tpu.memory_space<vmem>>, vector<4x1xf32>
      %cst_11 = arith.constant 3.906250e-03 : f32
      %14 = vector.broadcast %cst_11 : f32 to vector<4x1xf32>
      %15 = arith.mulf %13, %14 : vector<4x1xf32>
      %c0_12 = arith.constant 0 : index
      %c0_13 = arith.constant 0 : index
      %c0_14 = arith.constant 0 : index
      %16 = vector.load %arg3[%c0_12, %c0_13, %c0_14] : memref<1x4x1xf32, #tpu.memory_space<vmem>>, vector<1x4x1xf32>
      %17 = vector.shape_cast %16 : vector<1x4x1xf32> to vector<4x1xf32>
      %18 = vector.shape_cast %15 : vector<4x1xf32> to vector<1x4x1xf32>
      tpu.vector_store %arg3[%c0_12, %c0_13, %c0_14], %18 {strides = array<i32>} : memref<1x4x1xf32, #tpu.memory_space<vmem>>, vector<1x4x1xf32>,
    } else {
    }
    return
  }
  func.func @transform_0(%arg0: i32, %arg1: i32) -> (i32, i32, i32) {
    %c0_i32 = arith.constant 0 : i32
    %c0_i32_0 = arith.constant 0 : i32
    return %arg0, %c0_i32, %arg1 : i32, i32, i32
  }
  func.func @transform_1(%arg0: i32, %arg1: i32) -> (i32, i32, i32) {
    %c0_i32 = arith.constant 0 : i32
    %c0_i32_0 = arith.constant 0 : i32
    %c0_i32_1 = arith.constant 0 : i32
    return %arg0, %c0_i32, %c0_i32_0 : i32, i32, i32
  }
}

</mosaic_0001>

<bundles_post_ra>
// kernel: tpu_custom_call.1
= control target key start
LH: loop header
LB: loop body
LE: loop exit
PB: predicated region body
PF: predicated region fallthrough
CT: control target
= control target key end

     0   :  { %6 = vsyncpa [#allocation4], 0  ;;  %s510_s0 = inlined_call_operand.hbm [shape: f32[2,4,256], index: 0, kind: input, shape index: {}]   ;;  %s511_s1 = inlined_call_operand.vmem [shape: f32[2,4,1], index: 1, kind: output, shape index: {}]  }
   0x1   :  { %8 = vsyncpa [#allocation4 + $0x1], 0  ;;  %s419_s6 = smov 0   ;;  %s421_s7 = smov 0  }
   0x2   :  { %s423_s8 = smov 0   ;;  %s425_s9 = smov 0  }
   0x3   :  { %s427_s10 = smov 0   ;;  %s429_s11 = smov 0  }
   0x4 LB: > { %s257_s12 = sadd.s32 4294967295, %s406_s11   ;;  %s26_s13 = sadd.s32 1, %s402_s10  ;;  %s406_s11 = sphi %s429_s11, %s14_s11   ;;  %s402_s10 = sphi %s427_s10, %s518_s10   ;;  %s398_s9 = sphi %s425_s9, %s517_s9   ;;  %s394_s8 = sphi %s423_s8, %s516_s8   ;;  %s390_s7 = sphi %s421_s7, %s515_s7   ;;  %s386_s6 = sphi %s419_s6, %s514_s6  }
   0x5   : > { %p28_p0 = scmp.ge.s32.totalorder %s26_s13, 2  ;;  %s35_s14 = sadd.s32 1, %s394_s8 }
   0x6   : > { %p42_p1 = scmp.ne.s32.totalorder %s394_s8, %s390_s7  ;;  %p43_p2 = scmp.eq.s32.totalorder %s406_s11, 0 }
   0x7   : > { %s520_s13 = smov (%p28_p0, %s26_s13), 0  ;;  %p48_p4 = scmp.ne.s32.totalorder %s390_s7, %s386_s6 }
   0x8   : > { %p455_p3 = por %p43_p2, %p42_p1  ;;  %s30_s16 = ssub.s32 %s402_s10, %s520_s13 }
   0x9   : > { %p49_p5 = scmp.eq.s32.totalorder %s257_s12, 0  ;;  %p33_p6 = scmp.eq.s32.totalorder %s30_s16, 0 }
   0xa   : > { %p276_p8 = scmp.lt.s32.totalorder %s406_s11, 2  ;;  %s98_s19 = sand.u32 1, %s394_s8  }
   0xb   : > { %p462_p7 = por %p49_p5, %p48_p4  ;;  %s269_s20 = sshll.u32 %s402_s10, 3 }
   0xc   : > { %s468_s18 = scalar_select %p33_p6, %s394_s8, %s35_s14  }
   0xd   : > { %s261_s21 = sshll.u32 %s98_s19, 3  ;;  %s109_s24 = scalar_lea.hbm %s510_s0, %s269_s20 }
   0xe   : > { %s111_s25 = sshll.u32 %s109_s24, 4  ;;  %s102_s26 = scalar_lea.vmem [#allocation3], %s261_s21  ;;  %s112_s25 = int_to_ptr.hbm [resolvable:$true] %s111_s25 }
   0xf   : > { %s113_s27 = sshll.u32 %s102_s26, 4  ;;  %p273_p9 = pnand %p276_p8, %p455_p3  ;;  %s114_s27 = int_to_ptr.vmem [resolvable:$true] %s113_s27 }
  0x10   : > { %p264_p10 = scmp.ge.s32.totalorder %s406_s11, 1  ;;  %p118_p11 = scmp.lt.s32.totalorder %s406_s11, 3 }
  0x11   : > { %s99_s28 = scalar_lea.sflag [#allocation4], %s98_s19 }
  0x12   : > { %275 = dma.hbm_to_vmem [thread:$0]  (!%p273_p9), %s112_s25, 128, %s114_s27, %s99_s28  }
  0x13   : > { %p119_p12 = pnand %p264_p10, %p118_p11 }
  0x14   : > { %s124_s29 = sand.u32 (!%p119_p12), 1, %s390_s7  }
  0x15   : > { %122 = sbr.rel (%p119_p12) target bundleno = 169 (0xa9), region = 24  ;;  %s265_s30 = sshll.u32 (!%p119_p12), %s124_s29, 3 }
  0x16   : > { %s125_s2 = scalar_lea.sflag (!%p119_p12), [#allocation4], %s124_s29  ;;  %s128_s3 = scalar_lea.vmem (!%p119_p12), [#allocation3], %s265_s30 }
  0x1a   : > { %381 = dma.done.wait (%p462_p7), %s125_s2, 128  }
  0x1b   : > { %383 = vsyncadd (%p462_p7), %s125_s2, 4294967168  ;;  %vm156_vm0 = vcmask 3072   ;;  %v408_v0 = vmov 0.0   ;;  %v158_v1 = vld [vmem:[%s128_s3] sm:$0xff]  ;;  %vm166_vm1 = vcmask 1043456   ;;  %p148_p13 = scmp.lt.s32.totalorder %s398_s9, 1 }
  0x1c   : > { %157 = vst.msk [vmem:[#allocation2] sm:$0xf] %vm156_vm0, %v408_v0 }
  0x1d   : > { %161 = vst [vmem:[#allocation1] ss:$2 sm:$0xff] %v158_v1  ;;  %s522_s9 = smov (!%p148_p13, %s398_s9), 1 }
  0x1e   : > { %s266_s4 = sshll.u32 %s522_s9, 2 }
  0x1f   : > { %s151_s12 = scalar_lea.vmem %s511_s1, %s266_s4 }
  0x23   : > { %v159_v7 = vld [vmem:[#allocation2] sm:$0xf] }
  0x24   : > { %v162_v2 = vld.sshfl [vmem:[#allocation1] sm:$0xff pattern:$0x75316420]  ;;  %v163_v3 = vld.sshfl [vmem:[#allocation1 + $0x8] sm:$0xff pattern:$0x75316420] }
  0x25   : > { %v167_v4 = vsel %vm166_vm1, %v162_v2, 0.0  ;;  %v168_v5 = vsel %vm166_vm1, %v163_v3, 0.0 }
  0x26   : > { %v169_v6 = vadd.f32 %v168_v5, %v167_v4 }
  0x28   : > { %170 = vadd.xlane.f32.xlu0 %v169_v6 }
  0x9b   : > { %v171_v8 = vpop.xlane.xlu0 %170 }
  0x9c   : > { %v172_v9 = vadd.f32 %v171_v8, %v159_v7 }
  0x9e   : > { %174 = vst.msk [vmem:[#allocation2] sm:$0xf] %vm156_vm0, %v172_v9 }
  0xa5   : > { %v178_v10 = vld [vmem:[#allocation2] sm:$0xf] }
  0xa6   : > { %v179_v11 = vmul.f32 0.00390625, %v178_v10 }
  0xa8   : > { %180 = vst.msk [vmem:[%s151_s12] sm:$0xf] %vm156_vm0, %v179_v11 }
  0xa9 PF: > { %s14_s11 = sadd.s32 1, %s406_s11   ;;  %s514_s6 = smov %s390_s7 }
  0xaa   : > { %p11_p0 = scmp.ge.s32.totalorder %s14_s11, 4   ;;  %s515_s7 = smov %s394_s8 }
  0xab   : > { %s516_s8 = smov %s468_s18  ;;  %s517_s9 = smov %s402_s10 }
  0xac   : > { %s518_s10 = smov %s520_s13  ;;  %13 = sbr.rel (!%p11_p0) target bundleno = 4 (0x4), region = 72 }
  0xb1   :  { %200 = vsyncpa [#allocation4], 1 }
  0xb2   :  { %202 = vsyncpa [#allocation4 + $0x1], 1 }

</bundles_post_ra>
